<compile_context>
chip_gen: v5e
topology: v5e:2x2
jax: 0.10.0
libtpu: 0.0.40
codegen_flags: <defaults>
</compile_context>

<pallas_src>
import functools
import math

import jax
import jax.numpy as jnp
from jax import lax
from jax.experimental import pallas as pl
from jax.experimental.pallas import tpu as pltpu

_BN_EPS = 1e-5


def _tcn_kernel(x_ref, gamma_ref, beta_ref, w_ref, bias_ref, o_ref, *, seq_len, n_blocks):
    """Fused n_blocks-deep TCN.  x_ref/o_ref: (B*L, C).  Params stacked on a leading dim."""
    x = x_ref[...].astype(jnp.float32)                     # (N, C), N = B*L
    n_rows, c = x.shape

    # Per-row sequence position (rows are (b, l) flattened, l fastest). Computed once and
    # reused by every block's conv boundary masks (hoisted out of the unrolled loop).
    l_idx = lax.broadcasted_iota(jnp.int32, (n_rows, c), 0) % seq_len
    not_first = l_idx != 0                 # rows where a left  (l-1) tap exists
    not_last = l_idx != seq_len - 1        # rows where a right (l+1) tap exists

    for blk in range(n_blocks):            # statically unrolled (3 blocks)
        # --- BatchNorm1d, training mode (biased batch stats over all B*L rows), folded
        #     into a single scale/shift FMA, then ReLU.
        mean = jnp.mean(x, axis=0, keepdims=True)                        # (1, C)
        var = jnp.mean(jnp.square(x - mean), axis=0, keepdims=True)      # (1, C)
        scale = gamma_ref[blk] * lax.rsqrt(var + _BN_EPS)                # (1, C)
        shift = beta_ref[blk] - mean * scale                             # (1, C)
        xr = jnp.maximum(x * scale + shift, 0.0)                         # (N, C) f32
        xr_b = xr.astype(jnp.bfloat16)                                   # MXU operand

        # --- Conv1d(k=3, stride=1, pad=1): one bf16 MXU matmul per tap; the l-1 / l+1
        #     tap outputs are re-aligned with XLU sublane rolls + boundary masks (rolling
        #     the per-row matmul *outputs* avoids building shifted activation copies).
        z0 = jnp.dot(xr_b, w_ref[3 * blk + 0].astype(jnp.bfloat16),
                     preferred_element_type=jnp.float32)                 # tap for x[l-1]
        z1 = jnp.dot(xr_b, w_ref[3 * blk + 1].astype(jnp.bfloat16),
                     preferred_element_type=jnp.float32)                 # center tap x[l]
        z2 = jnp.dot(xr_b, w_ref[3 * blk + 2].astype(jnp.bfloat16),
                     preferred_element_type=jnp.float32)                 # tap for x[l+1]

        y = z1
        y = y + jnp.where(not_first, pltpu.roll(z0, shift=1, axis=0), 0.0)
        y = y + jnp.where(not_last, pltpu.roll(z2, shift=n_rows - 1, axis=0), 0.0)
        y = y + bias_ref[blk]                                            # (1, C) broadcast

        # --- Dropout(p=0) is the identity; trailing ReLU feeds the next block.
        x = jnp.maximum(y, 0.0)

    o_ref[...] = x.astype(o_ref.dtype)


@jax.jit
def tcn_forward(x, params):
    """x: (B, L, C) channels-last.  params: list of (gamma(C,), beta(C,), w(3,C,C), bias(C,))."""
    b_dim, l_dim, c = x.shape
    for gamma, beta, w, bias in params:
        # The PyTorch module only makes sense with in == hidden == out channels, and the
        # conv weight must already be permuted to (K=3, C_in, C_out).
        assert w.shape == (3, c, c), "expect weight (K=3, C_in, C_out) with C_in == C_out == C"
        assert gamma.shape[-1] == c and beta.shape[-1] == c and bias.shape[-1] == c

    n_blocks = len(params)
    # Stack per-block params so the whole TCN runs in a single pallas_call.
    gammas = jnp.stack([g.reshape(1, c) for g, _, _, _ in params])        # (nb, 1, C)
    betas = jnp.stack([b.reshape(1, c) for _, b, _, _ in params])         # (nb, 1, C)
    biases = jnp.stack([bb.reshape(1, c) for _, _, _, bb in params])      # (nb, 1, C)
    w_stack = jnp.concatenate([w for _, _, w, _ in params], axis=0)       # (3*nb, C, C)

    # Whole-tensor-in-VMEM design: fine for small shapes (a few KiB here).
    act_bytes = b_dim * l_dim * c * 4
    assert act_bytes * 8 < 32 * 1024 * 1024, "activation too large for whole-tensor kernel"
    # TODO(synk): for production shapes, hoist BN stats (per-block two-pass) and grid-tile
    # over (B, L) with a 1-row halo; for C a multiple of 128, lane-pack the 3 taps into one
    # wide (C, 3C) weight so the conv is a single MXU matmul.

    kernel = functools.partial(_tcn_kernel, seq_len=l_dim, n_blocks=n_blocks)
    vmem = pl.BlockSpec(memory_space=pltpu.MemorySpace.VMEM)
    out = pl.pallas_call(
        kernel,
        out_shape=jax.ShapeDtypeStruct((b_dim * l_dim, c), jnp.float32),
        in_specs=[vmem, vmem, vmem, vmem, vmem],
        out_specs=vmem,
        compiler_params=pltpu.CompilerParams(vmem_limit_bytes=32 * 1024 * 1024),
    )(x.reshape(b_dim * l_dim, c), gammas, betas, w_stack, biases)
    return out.reshape(b_dim, l_dim, c)


# ---------------- pure-JAX reference (independent conv formulation; bf16 at the MXU) ----
def _ref_forward(x, params):
    for gamma, beta, w, bias in params:
        _, l_dim, c = x.shape
        mean = jnp.mean(x, axis=(0, 1), keepdims=True)
        var = jnp.mean(jnp.square(x - mean), axis=(0, 1), keepdims=True)
        scale = gamma.reshape(1, 1, c) * lax.rsqrt(var + _BN_EPS)
        shift = beta.reshape(1, 1, c) - mean * scale
        xr = jnp.maximum(x * scale + shift, 0.0).astype(jnp.bfloat16)
        xpad = jnp.pad(xr, ((0, 0), (1, 1), (0, 0)))
        y = sum(
            jnp.einsum("blc,cd->bld", xpad[:, k:k + l_dim, :], w[k].astype(jnp.bfloat16),
                       preferred_element_type=jnp.float32)
            for k in range(3))
        x = jnp.maximum(y + bias.reshape(1, 1, c), 0.0)
    return x


if __name__ == "__main__":
    # Small shapes: batch=2, seq length L=16, channels C=16 (in == hidden == out, see NOTE).
    B, L, C = 2, 16, 16
    key = jax.random.PRNGKey(0)
    keys = jax.random.split(key, 7)
    x = jax.random.normal(keys[0], (B, L, C), jnp.float32)

    # Deterministic init mirroring PyTorch defaults: BN gamma=1 / beta=0,
    # Conv1d weight/bias ~ U(-1/sqrt(fan_in), 1/sqrt(fan_in)) with fan_in = C*3.
    bound = 1.0 / math.sqrt(C * 3)
    params = []
    for i in range(3):
        w = jax.random.uniform(keys[1 + 2 * i], (3, C, C), jnp.float32, -bound, bound)
        b = jax.random.uniform(keys[2 + 2 * i], (C,), jnp.float32, -bound, bound)
        gamma = jnp.ones((C,), jnp.float32)
        beta = jnp.zeros((C,), jnp.float32)
        params.append((gamma, beta, w, b))

    out = jax.block_until_ready(tcn_forward(x, params))
    ref = _ref_forward(x, params)
    assert out.shape == (B, L, C) and out.dtype == jnp.float32
    assert jnp.allclose(out, ref, atol=2e-3, rtol=2e-3), "Pallas kernel mismatch vs reference"
    print("KERNEL_OK")
</pallas_src>

<mosaic_0001>
module attributes {stable_mosaic.version = 11 : i64} {
  func.func @_tcn_kernel(%arg0: memref<32x16xf32, #tpu.memory_space<vmem>>, %arg1: memref<3x1x16xf32, #tpu.memory_space<vmem>>, %arg2: memref<3x1x16xf32, #tpu.memory_space<vmem>>, %arg3: memref<9x16x16xf32, #tpu.memory_space<vmem>>, %arg4: memref<3x1x16xf32, #tpu.memory_space<vmem>>, %arg5: memref<32x16xf32, #tpu.memory_space<vmem>>) attributes {dimension_semantics = [], scalar_prefetch = 0 : i64, scratch_operands = 0 : i64, tpu.core_type = #tpu.core_type<tc>} {
    %c0 = arith.constant 0 : index
    %c0_0 = arith.constant 0 : index
    %0 = vector.load %arg0[%c0, %c0_0] : memref<32x16xf32, #tpu.memory_space<vmem>>, vector<32x16xf32>
    %1 = tpu.iota {dimensions = array<i32: 0>} : vector<32x16xi32>
    %c16_i32 = arith.constant 16 : i32
    %c0_i32 = arith.constant 0 : i32
    %2 = arith.cmpi eq, %c16_i32, %c0_i32 : i32
    %c1_i32 = arith.constant 1 : i32
    %3 = arith.select %2, %c1_i32, %c16_i32 : i32
    %4 = vector.broadcast %3 : i32 to vector<32x16xi32>
    %5 = arith.remsi %1, %4 : vector<32x16xi32>
    %c0_i32_1 = arith.constant 0 : i32
    %6 = vector.broadcast %c0_i32_1 : i32 to vector<32x16xi32>
    %7 = arith.cmpi ne, %5, %6 : vector<32x16xi32>
    %c0_i32_2 = arith.constant 0 : i32
    %8 = vector.broadcast %c0_i32_2 : i32 to vector<32x16xi32>
    %9 = arith.cmpi slt, %5, %8 : vector<32x16xi32>
    %c0_i32_3 = arith.constant 0 : i32
    %10 = arith.cmpi slt, %3, %c0_i32_3 : i32
    %11 = vector.broadcast %10 : i1 to vector<32x16xi1>
    %12 = vector.broadcast %11 : vector<32x16xi1> to vector<32x16xi1>
    %13 = arith.xori %9, %12 : vector<32x16xi1>
    %14 = arith.andi %13, %7 : vector<32x16xi1>
    %15 = vector.broadcast %3 : i32 to vector<32x16xi32>
    %16 = arith.addi %5, %15 : vector<32x16xi32>
    %17 = arith.select %14, %16, %5 : vector<32x16xi1>, vector<32x16xi32>
    %c0_i32_4 = arith.constant 0 : i32
    %18 = vector.broadcast %c0_i32_4 : i32 to vector<32x16xi32>
    %19 = arith.cmpi ne, %17, %18 : vector<32x16xi32>
    %c15_i32 = arith.constant 15 : i32
    %20 = vector.broadcast %c15_i32 : i32 to vector<32x16xi32>
    %21 = arith.cmpi ne, %17, %20 : vector<32x16xi32>
    %cst = arith.constant dense<0.000000e+00> : vector<16xf32>
    %22 = vector.multi_reduction <add>, %0, %cst [0] : vector<32x16xf32> to vector<16xf32>
    %23 = vector.shape_cast %22 : vector<16xf32> to vector<1x16xf32>
    %cst_5 = arith.constant 3.200000e+01 : f32
    %24 = vector.broadcast %cst_5 : f32 to vector<1x16xf32>
    %25 = arith.divf %23, %24 : vector<1x16xf32>
    %26 = vector.broadcast %25 : vector<1x16xf32> to vector<32x16xf32>
    %27 = arith.subf %0, %26 : vector<32x16xf32>
    %28 = arith.mulf %27, %27 : vector<32x16xf32>
    %cst_6 = arith.constant dense<0.000000e+00> : vector<16xf32>
    %29 = vector.multi_reduction <add>, %28, %cst_6 [0] : vector<32x16xf32> to vector<16xf32>
    %30 = vector.shape_cast %29 : vector<16xf32> to vector<1x16xf32>
    %cst_7 = arith.constant 3.200000e+01 : f32
    %31 = vector.broadcast %cst_7 : f32 to vector<1x16xf32>
    %32 = arith.divf %30, %31 : vector<1x16xf32>
    %c0_8 = arith.constant 0 : index
    %c0_9 = arith.constant 0 : index
    %c0_10 = arith.constant 0 : index
    %33 = vector.load %arg1[%c0_8, %c0_9, %c0_10] : memref<3x1x16xf32, #tpu.memory_space<vmem>>, vector<1x1x16xf32>
    %34 = vector.shape_cast %33 : vector<1x1x16xf32> to vector<1x16xf32>
    %cst_11 = arith.constant 9.99999974E-6 : f32
    %35 = vector.broadcast %cst_11 : f32 to vector<1x16xf32>
    %36 = arith.addf %32, %35 : vector<1x16xf32>
    %37 = math.rsqrt %36 : vector<1x16xf32>
    %38 = arith.mulf %34, %37 : vector<1x16xf32>
    %c0_12 = arith.constant 0 : index
    %c0_13 = arith.constant 0 : index
    %c0_14 = arith.constant 0 : index
    %39 = vector.load %arg2[%c0_12, %c0_13, %c0_14] : memref<3x1x16xf32, #tpu.memory_space<vmem>>, vector<1x1x16xf32>
    %40 = vector.shape_cast %39 : vector<1x1x16xf32> to vector<1x16xf32>
    %41 = arith.mulf %25, %38 : vector<1x16xf32>
    %42 = arith.subf %40, %41 : vector<1x16xf32>
    %43 = vector.broadcast %38 : vector<1x16xf32> to vector<32x16xf32>
    %44 = arith.mulf %0, %43 : vector<32x16xf32>
    %45 = vector.broadcast %42 : vector<1x16xf32> to vector<32x16xf32>
    %46 = arith.addf %44, %45 : vector<32x16xf32>
    %cst_15 = arith.constant 0.000000e+00 : f32
    %47 = vector.broadcast %cst_15 : f32 to vector<32x16xf32>
    %48 = arith.maximumf %46, %47 : vector<32x16xf32>
    %49 = arith.truncf %48 : vector<32x16xf32> to vector<32x16xbf16>
    %c0_16 = arith.constant 0 : index
    %c0_17 = arith.constant 0 : index
    %c0_18 = arith.constant 0 : index
    %50 = vector.load %arg3[%c0_16, %c0_17, %c0_18] : memref<9x16x16xf32, #tpu.memory_space<vmem>>, vector<1x16x16xf32>
    %51 = vector.shape_cast %50 : vector<1x16x16xf32> to vector<16x16xf32>
    %52 = arith.truncf %51 : vector<16x16xf32> to vector<16x16xbf16>
    %cst_19 = arith.constant dense<0.000000e+00> : vector<32x16xf32>
    %53 = tpu.matmul %49, %52, %cst_19 {dimension_numbers = #tpu.dot_dimension_numbers<[1], [0], [0], [1], [0, 0, 1, 1], [], []>} : vector<32x16xbf16>, vector<16x16xbf16>, vector<32x16xf32> -> vector<32x16xf32>
    %c1 = arith.constant 1 : index
    %c0_20 = arith.constant 0 : index
    %c0_21 = arith.constant 0 : index
    %54 = vector.load %arg3[%c1, %c0_20, %c0_21] : memref<9x16x16xf32, #tpu.memory_space<vmem>>, vector<1x16x16xf32>
    %55 = vector.shape_cast %54 : vector<1x16x16xf32> to vector<16x16xf32>
    %56 = arith.truncf %55 : vector<16x16xf32> to vector<16x16xbf16>
    %cst_22 = arith.constant dense<0.000000e+00> : vector<32x16xf32>
    %57 = tpu.matmul %49, %56, %cst_22 {dimension_numbers = #tpu.dot_dimension_numbers<[1], [0], [0], [1], [0, 0, 1, 1], [], []>} : vector<32x16xbf16>, vector<16x16xbf16>, vector<32x16xf32> -> vector<32x16xf32>
    %c2 = arith.constant 2 : index
    %c0_23 = arith.constant 0 : index
    %c0_24 = arith.constant 0 : index
    %58 = vector.load %arg3[%c2, %c0_23, %c0_24] : memref<9x16x16xf32, #tpu.memory_space<vmem>>, vector<1x16x16xf32>
    %59 = vector.shape_cast %58 : vector<1x16x16xf32> to vector<16x16xf32>
    %60 = arith.truncf %59 : vector<16x16xf32> to vector<16x16xbf16>
    %cst_25 = arith.constant dense<0.000000e+00> : vector<32x16xf32>
    %61 = tpu.matmul %49, %60, %cst_25 {dimension_numbers = #tpu.dot_dimension_numbers<[1], [0], [0], [1], [0, 0, 1, 1], [], []>} : vector<32x16xbf16>, vector<16x16xbf16>, vector<32x16xf32> -> vector<32x16xf32>
    %c1_i32_26 = arith.constant 1 : i32
    %62 = tpu.dynamic_rotate %53 by %c1_i32_26 dim 0 : vector<32x16xf32>, i32 -> vector<32x16xf32>
    %cst_27 = arith.constant 0.000000e+00 : f32
    %63 = vector.broadcast %cst_27 : f32 to vector<32x16xf32>
    %64 = arith.select %19, %62, %63 : vector<32x16xi1>, vector<32x16xf32>
    %65 = arith.addf %57, %64 : vector<32x16xf32>
    %c31_i32 = arith.constant 31 : i32
    %66 = tpu.dynamic_rotate %61 by %c31_i32 dim 0 : vector<32x16xf32>, i32 -> vector<32x16xf32>
    %cst_28 = arith.constant 0.000000e+00 : f32
    %67 = vector.broadcast %cst_28 : f32 to vector<32x16xf32>
    %68 = arith.select %21, %66, %67 : vector<32x16xi1>, vector<32x16xf32>
    %69 = arith.addf %65, %68 : vector<32x16xf32>
    %c0_29 = arith.constant 0 : index
    %c0_30 = arith.constant 0 : index
    %c0_31 = arith.constant 0 : index
    %70 = vector.load %arg4[%c0_29, %c0_30, %c0_31] : memref<3x1x16xf32, #tpu.memory_space<vmem>>, vector<1x1x16xf32>
    %71 = vector.shape_cast %70 : vector<1x1x16xf32> to vector<1x16xf32>
    %72 = vector.broadcast %71 : vector<1x16xf32> to vector<32x16xf32>
    %73 = arith.addf %69, %72 : vector<32x16xf32>
    %cst_32 = arith.constant 0.000000e+00 : f32
    %74 = vector.broadcast %cst_32 : f32 to vector<32x16xf32>
    %75 = arith.maximumf %73, %74 : vector<32x16xf32>
    %cst_33 = arith.constant dense<0.000000e+00> : vector<16xf32>
    %76 = vector.multi_reduction <add>, %75, %cst_33 [0] : vector<32x16xf32> to vector<16xf32>
    %77 = vector.shape_cast %76 : vector<16xf32> to vector<1x16xf32>
    %cst_34 = arith.constant 3.200000e+01 : f32
    %78 = vector.broadcast %cst_34 : f32 to vector<1x16xf32>
    %79 = arith.divf %77, %78 : vector<1x16xf32>
    %80 = vector.broadcast %79 : vector<1x16xf32> to vector<32x16xf32>
    %81 = arith.subf %75, %80 : vector<32x16xf32>
    %82 = arith.mulf %81, %81 : vector<32x16xf32>
    %cst_35 = arith.constant dense<0.000000e+00> : vector<16xf32>
    %83 = vector.multi_reduction <add>, %82, %cst_35 [0] : vector<32x16xf32> to vector<16xf32>
    %84 = vector.shape_cast %83 : vector<16xf32> to vector<1x16xf32>
    %cst_36 = arith.constant 3.200000e+01 : f32
    %85 = vector.broadcast %cst_36 : f32 to vector<1x16xf32>
    %86 = arith.divf %84, %85 : vector<1x16xf32>
    %c1_37 = arith.constant 1 : index
    %c0_38 = arith.constant 0 : index
    %c0_39 = arith.constant 0 : index
    %87 = vector.load %arg1[%c1_37, %c0_38, %c0_39] : memref<3x1x16xf32, #tpu.memory_space<vmem>>, vector<1x1x16xf32>
    %88 = vector.shape_cast %87 : vector<1x1x16xf32> to vector<1x16xf32>
    %cst_40 = arith.constant 9.99999974E-6 : f32
    %89 = vector.broadcast %cst_40 : f32 to vector<1x16xf32>
    %90 = arith.addf %86, %89 : vector<1x16xf32>
    %91 = math.rsqrt %90 : vector<1x16xf32>
    %92 = arith.mulf %88, %91 : vector<1x16xf32>
    %c1_41 = arith.constant 1 : index
    %c0_42 = arith.constant 0 : index
    %c0_43 = arith.constant 0 : index
    %93 = vector.load %arg2[%c1_41, %c0_42, %c0_43] : memref<3x1x16xf32, #tpu.memory_space<vmem>>, vector<1x1x16xf32>
    %94 = vector.shape_cast %93 : vector<1x1x16xf32> to vector<1x16xf32>
    %95 = arith.mulf %79, %92 : vector<1x16xf32>
    %96 = arith.subf %94, %95 : vector<1x16xf32>
    %97 = vector.broadcast %92 : vector<1x16xf32> to vector<32x16xf32>
    %98 = arith.mulf %75, %97 : vector<32x16xf32>
    %99 = vector.broadcast %96 : vector<1x16xf32> to vector<32x16xf32>
    %100 = arith.addf %98, %99 : vector<32x16xf32>
    %cst_44 = arith.constant 0.000000e+00 : f32
    %101 = vector.broadcast %cst_44 : f32 to vector<32x16xf32>
    %102 = arith.maximumf %100, %101 : vector<32x16xf32>
    %103 = arith.truncf %102 : vector<32x16xf32> to vector<32x16xbf16>
    %c3 = arith.constant 3 : index
    %c0_45 = arith.constant 0 : index
    %c0_46 = arith.constant 0 : index
    %104 = vector.load %arg3[%c3, %c0_45, %c0_46] : memref<9x16x16xf32, #tpu.memory_space<vmem>>, vector<1x16x16xf32>
    %105 = vector.shape_cast %104 : vector<1x16x16xf32> to vector<16x16xf32>
    %106 = arith.truncf %105 : vector<16x16xf32> to vector<16x16xbf16>
    %cst_47 = arith.constant dense<0.000000e+00> : vector<32x16xf32>
    %107 = tpu.matmul %103, %106, %cst_47 {dimension_numbers = #tpu.dot_dimension_numbers<[1], [0], [0], [1], [0, 0, 1, 1], [], []>} : vector<32x16xbf16>, vector<16x16xbf16>, vector<32x16xf32> -> vector<32x16xf32>
    %c4 = arith.constant 4 : index
    %c0_48 = arith.constant 0 : index
    %c0_49 = arith.constant 0 : index
    %108 = vector.load %arg3[%c4, %c0_48, %c0_49] : memref<9x16x16xf32, #tpu.memory_space<vmem>>, vector<1x16x16xf32>
    %109 = vector.shape_cast %108 : vector<1x16x16xf32> to vector<16x16xf32>
    %110 = arith.truncf %109 : vector<16x16xf32> to vector<16x16xbf16>
    %cst_50 = arith.constant dense<0.000000e+00> : vector<32x16xf32>
    %111 = tpu.matmul %103, %110, %cst_50 {dimension_numbers = #tpu.dot_dimension_numbers<[1], [0], [0], [1], [0, 0, 1, 1], [], []>} : vector<32x16xbf16>, vector<16x16xbf16>, vector<32x16xf32> -> vector<32x16xf32>
    %c5 = arith.constant 5 : index
    %c0_51 = arith.constant 0 : index
    %c0_52 = arith.constant 0 : index
    %112 = vector.load %arg3[%c5, %c0_51, %c0_52] : memref<9x16x16xf32, #tpu.memory_space<vmem>>, vector<1x16x16xf32>
    %113 = vector.shape_cast %112 : vector<1x16x16xf32> to vector<16x16xf32>
    %114 = arith.truncf %113 : vector<16x16xf32> to vector<16x16xbf16>
    %cst_53 = arith.constant dense<0.000000e+00> : vector<32x16xf32>
    %115 = tpu.matmul %103, %114, %cst_53 {dimension_numbers = #tpu.dot_dimension_numbers<[1], [0], [0], [1], [0, 0, 1, 1], [], []>} : vector<32x16xbf16>, vector<16x16xbf16>, vector<32x16xf32> -> vector<32x16xf32>
    %c1_i32_54 = arith.constant 1 : i32
    %116 = tpu.dynamic_rotate %107 by %c1_i32_54 dim 0 : vector<32x16xf32>, i32 -> vector<32x16xf32>
    %cst_55 = arith.constant 0.000000e+00 : f32
    %117 = vector.broadcast %cst_55 : f32 to vector<32x16xf32>
    %118 = arith.select %19, %116, %117 : vector<32x16xi1>, vector<32x16xf32>
    %119 = arith.addf %111, %118 : vector<32x16xf32>
    %c31_i32_56 = arith.constant 31 : i32
    %120 = tpu.dynamic_rotate %115 by %c31_i32_56 dim 0 : vector<32x16xf32>, i32 -> vector<32x16xf32>
    %cst_57 = arith.constant 0.000000e+00 : f32
    %121 = vector.broadcast %cst_57 : f32 to vector<32x16xf32>
    %122 = arith.select %21, %120, %121 : vector<32x16xi1>, vector<32x16xf32>
    %123 = arith.addf %119, %122 : vector<32x16xf32>
    %c1_58 = arith.constant 1 : index
    %c0_59 = arith.constant 0 : index
    %c0_60 = arith.constant 0 : index
    %124 = vector.load %arg4[%c1_58, %c0_59, %c0_60] : memref<3x1x16xf32, #tpu.memory_space<vmem>>, vector<1x1x16xf32>
    %125 = vector.shape_cast %124 : vector<1x1x16xf32> to vector<1x16xf32>
    %126 = vector.broadcast %125 : vector<1x16xf32> to vector<32x16xf32>
    %127 = arith.addf %123, %126 : vector<32x16xf32>
    %cst_61 = arith.constant 0.000000e+00 : f32
    %128 = vector.broadcast %cst_61 : f32 to vector<32x16xf32>
    %129 = arith.maximumf %127, %128 : vector<32x16xf32>
    %cst_62 = arith.constant dense<0.000000e+00> : vector<16xf32>
    %130 = vector.multi_reduction <add>, %129, %cst_62 [0] : vector<32x16xf32> to vector<16xf32>
    %131 = vector.shape_cast %130 : vector<16xf32> to vector<1x16xf32>
    %cst_63 = arith.constant 3.200000e+01 : f32
    %132 = vector.broadcast %cst_63 : f32 to vector<1x16xf32>
    %133 = arith.divf %131, %132 : vector<1x16xf32>
    %134 = vector.broadcast %133 : vector<1x16xf32> to vector<32x16xf32>
    %135 = arith.subf %129, %134 : vector<32x16xf32>
    %136 = arith.mulf %135, %135 : vector<32x16xf32>
    %cst_64 = arith.constant dense<0.000000e+00> : vector<16xf32>
    %137 = vector.multi_reduction <add>, %136, %cst_64 [0] : vector<32x16xf32> to vector<16xf32>
    %138 = vector.shape_cast %137 : vector<16xf32> to vector<1x16xf32>
    %cst_65 = arith.constant 3.200000e+01 : f32
    %139 = vector.broadcast %cst_65 : f32 to vector<1x16xf32>
    %140 = arith.divf %138, %139 : vector<1x16xf32>
    %c2_66 = arith.constant 2 : index
    %c0_67 = arith.constant 0 : index
    %c0_68 = arith.constant 0 : index
    %141 = vector.load %arg1[%c2_66, %c0_67, %c0_68] : memref<3x1x16xf32, #tpu.memory_space<vmem>>, vector<1x1x16xf32>
    %142 = vector.shape_cast %141 : vector<1x1x16xf32> to vector<1x16xf32>
    %cst_69 = arith.constant 9.99999974E-6 : f32
    %143 = vector.broadcast %cst_69 : f32 to vector<1x16xf32>
    %144 = arith.addf %140, %143 : vector<1x16xf32>
    %145 = math.rsqrt %144 : vector<1x16xf32>
    %146 = arith.mulf %142, %145 : vector<1x16xf32>
    %c2_70 = arith.constant 2 : index
    %c0_71 = arith.constant 0 : index
    %c0_72 = arith.constant 0 : index
    %147 = vector.load %arg2[%c2_70, %c0_71, %c0_72] : memref<3x1x16xf32, #tpu.memory_space<vmem>>, vector<1x1x16xf32>
    %148 = vector.shape_cast %147 : vector<1x1x16xf32> to vector<1x16xf32>
    %149 = arith.mulf %133, %146 : vector<1x16xf32>
    %150 = arith.subf %148, %149 : vector<1x16xf32>
    %151 = vector.broadcast %146 : vector<1x16xf32> to vector<32x16xf32>
    %152 = arith.mulf %129, %151 : vector<32x16xf32>
    %153 = vector.broadcast %150 : vector<1x16xf32> to vector<32x16xf32>
    %154 = arith.addf %152, %153 : vector<32x16xf32>
    %cst_73 = arith.constant 0.000000e+00 : f32
    %155 = vector.broadcast %cst_73 : f32 to vector<32x16xf32>
    %156 = arith.maximumf %154, %155 : vector<32x16xf32>
    %157 = arith.truncf %156 : vector<32x16xf32> to vector<32x16xbf16>
    %c6 = arith.constant 6 : index
    %c0_74 = arith.constant 0 : index
    %c0_75 = arith.constant 0 : index
    %158 = vector.load %arg3[%c6, %c0_74, %c0_75] : memref<9x16x16xf32, #tpu.memory_space<vmem>>, vector<1x16x16xf32>
    %159 = vector.shape_cast %158 : vector<1x16x16xf32> to vector<16x16xf32>
    %160 = arith.truncf %159 : vector<16x16xf32> to vector<16x16xbf16>
    %cst_76 = arith.constant dense<0.000000e+00> : vector<32x16xf32>
    %161 = tpu.matmul %157, %160, %cst_76 {dimension_numbers = #tpu.dot_dimension_numbers<[1], [0], [0], [1], [0, 0, 1, 1], [], []>} : vector<32x16xbf16>, vector<16x16xbf16>, vector<32x16xf32> -> vector<32x16xf32>
    %c7 = arith.constant 7 : index
    %c0_77 = arith.constant 0 : index
    %c0_78 = arith.constant 0 : index
    %162 = vector.load %arg3[%c7, %c0_77, %c0_78] : memref<9x16x16xf32, #tpu.memory_space<vmem>>, vector<1x16x16xf32>
    %163 = vector.shape_cast %162 : vector<1x16x16xf32> to vector<16x16xf32>
    %164 = arith.truncf %163 : vector<16x16xf32> to vector<16x16xbf16>
    %cst_79 = arith.constant dense<0.000000e+00> : vector<32x16xf32>
    %165 = tpu.matmul %157, %164, %cst_79 {dimension_numbers = #tpu.dot_dimension_numbers<[1], [0], [0], [1], [0, 0, 1, 1], [], []>} : vector<32x16xbf16>, vector<16x16xbf16>, vector<32x16xf32> -> vector<32x16xf32>
    %c8 = arith.constant 8 : index
    %c0_80 = arith.constant 0 : index
    %c0_81 = arith.constant 0 : index
    %166 = vector.load %arg3[%c8, %c0_80, %c0_81] : memref<9x16x16xf32, #tpu.memory_space<vmem>>, vector<1x16x16xf32>
    %167 = vector.shape_cast %166 : vector<1x16x16xf32> to vector<16x16xf32>
    %168 = arith.truncf %167 : vector<16x16xf32> to vector<16x16xbf16>
    %cst_82 = arith.constant dense<0.000000e+00> : vector<32x16xf32>
    %169 = tpu.matmul %157, %168, %cst_82 {dimension_numbers = #tpu.dot_dimension_numbers<[1], [0], [0], [1], [0, 0, 1, 1], [], []>} : vector<32x16xbf16>, vector<16x16xbf16>, vector<32x16xf32> -> vector<32x16xf32>
    %c1_i32_83 = arith.constant 1 : i32
    %170 = tpu.dynamic_rotate %161 by %c1_i32_83 dim 0 : vector<32x16xf32>, i32 -> vector<32x16xf32>
    %cst_84 = arith.constant 0.000000e+00 : f32
    %171 = vector.broadcast %cst_84 : f32 to vector<32x16xf32>
    %172 = arith.select %19, %170, %171 : vector<32x16xi1>, vector<32x16xf32>
    %173 = arith.addf %165, %172 : vector<32x16xf32>
    %c31_i32_85 = arith.constant 31 : i32
    %174 = tpu.dynamic_rotate %169 by %c31_i32_85 dim 0 : vector<32x16xf32>, i32 -> vector<32x16xf32>
    %cst_86 = arith.constant 0.000000e+00 : f32
    %175 = vector.broadcast %cst_86 : f32 to vector<32x16xf32>
    %176 = arith.select %21, %174, %175 : vector<32x16xi1>, vector<32x16xf32>
    %177 = arith.addf %173, %176 : vector<32x16xf32>
    %c2_87 = arith.constant 2 : index
    %c0_88 = arith.constant 0 : index
    %c0_89 = arith.constant 0 : index
    %178 = vector.load %arg4[%c2_87, %c0_88, %c0_89] : memref<3x1x16xf32, #tpu.memory_space<vmem>>, vector<1x1x16xf32>
    %179 = vector.shape_cast %178 : vector<1x1x16xf32> to vector<1x16xf32>
    %180 = vector.broadcast %179 : vector<1x16xf32> to vector<32x16xf32>
    %181 = arith.addf %177, %180 : vector<32x16xf32>
    %cst_90 = arith.constant 0.000000e+00 : f32
    %182 = vector.broadcast %cst_90 : f32 to vector<32x16xf32>
    %183 = arith.maximumf %181, %182 : vector<32x16xf32>
    %c0_91 = arith.constant 0 : index
    %c0_92 = arith.constant 0 : index
    %184 = vector.load %arg5[%c0_91, %c0_92] : memref<32x16xf32, #tpu.memory_space<vmem>>, vector<32x16xf32>
    tpu.vector_store %arg5[%c0_91, %c0_92], %183 {strides = array<i32>} : memref<32x16xf32, #tpu.memory_space<vmem>>, vector<32x16xf32>,
    return
  }
}

</mosaic_0001>

<bundles_post_ra>
// kernel: tcn_forward.1
= control target key start
LH: loop header
LB: loop body
LE: loop exit
PB: predicated region body
PF: predicated region fallthrough
CT: control target
= control target key end

     0   :  { %vm87_vm0 = vcmask 130048   ;;  %v767_v7 = vmov 32.0   ;;  %s1107_s0 = inlined_call_operand.vmem [shape: f32[32,16], index: 0, kind: input, shape index: {}]   ;;  %s1108_s1 = inlined_call_operand.vmem [shape: f32[3,1,16], index: 1, kind: input, shape index: {}]   ;;  %s1109_s2 = inlined_call_operand.vmem [shape: f32[3,1,16], index: 2, kind: input, shape index: {}]   ;;  %s1110_s3 = inlined_call_operand.vmem [shape: f32[9,16,16], index: 3, kind: input, shape index: {}]   ;;  %s1111_s4 = inlined_call_operand.vmem [shape: f32[3,1,16], index: 4, kind: input, shape index: {}]   ;;  %s1112_s5 = inlined_call_operand.hbm [shape: f32[32,16], index: 5, kind: output, shape index: {}]  }
   0x1   :  { %v167_v0 = vld [vmem:[%s1110_s3] sm:$0xff]  ;;  %v168_v1 = vld [vmem:[%s1110_s3 + $0x8] sm:$0xff]  ;;  %v687_v2 = vld [vmem:[%s1110_s3 + $0x10] sm:$0xff]  ;;  %733 = vrcp.f32 %v767_v7 }
   0x2   :  { %v169_v3 = vpack.c.bf16 %v168_v1, %v167_v0  ;;  %v688_v4 = vld [vmem:[%s1110_s3 + $0x18] sm:$0xff]  ;;  %v816_v5 = vld [vmem:[%s1107_s0] sm:$0xff]  ;;  %v821_v6 = vld [vmem:[%s1107_s0 + $0x8] sm:$0xff] }
   0x3   :  { %v198_v8 = vpack.c.bf16 %v688_v4, %v687_v2  ;;  %v826_v9 = vld [vmem:[%s1107_s0 + $0x10] sm:$0xff]  ;;  %v831_v10 = vld [vmem:[%s1107_s0 + $0x18] sm:$0xff]  ;;  %v88_v11 = vsel %vm87_vm0, %v816_v5, 0.0  ;;  %v89_v12 = vsel %vm87_vm0, %v821_v6, 0.0 }
   0x4   :  { %183 = vmatpush.bf16.msra.mxu0 %v169_v3  ;;  %725 = vmatpush.bf16.msra.mxu1 %v169_v3  ;;  %v90_v13 = vadd.f32 %v89_v12, %v88_v11  ;;  %v91_v14 = vsel %vm87_vm0, %v826_v9, 0.0  ;;  %v93_v15 = vsel %vm87_vm0, %v831_v10, 0.0 }
   0x5   :  { %242 = vmatpush.bf16.msra.mxu2 %v198_v8 }
   0x6   :  { %10 = vsyncpa [#allocation3], 0  ;;  %v92_v16 = vadd.f32 %v91_v14, %v90_v13  ;;  %v689_v54 = vld [vmem:[%s1110_s3 + $0x20] sm:$0xff]  ;;  %v690_v55 = vld [vmem:[%s1110_s3 + $0x28] sm:$0xff]  ;;  %s673_s28 = sshll.u32 %s1112_s5, 4  ;;  %s769_s29 = smov 128   ;;  %s674_s28 = int_to_ptr.hbm [resolvable:$true] %s673_s28 }
   0x7   :  { %v734_v17 = vpop.eup %733  ;;  %v202_v56 = vpack.c.bf16 %v690_v55, %v689_v54  ;;  %v131_v62 = vld [vmem:[%s1108_s1] sm:$0x1]  ;;  %s770_s30 = smov 8  }
   0x8   :  { %v94_v18 = vadd.f32 %v93_v15, %v92_v16  ;;  %v102_v19 = vmul.f32 32.0, %v734_v17  ;;  %vm106_vm1 = vweird.f32 %v734_v17  ;;  %v144_v2 = vld [vmem:[%s1109_s2] sm:$0x1] }
   0x9   :  { %210 = vmatpush.bf16.msrb.mxu1 %v202_v56 }
   0xa   :  { %v95_v20 = vrot.slane %v94_v18, 4  ;;  %v103_v21 = vsub.f32 1.0, %v102_v19 }
   0xc   :  { %v96_v22 = vadd.f32 %v95_v20, %v94_v18  ;;  %v104_v23 = vmul.f32 %v734_v17, %v103_v21 }
   0xe   :  { %v97_v24 = vrot.slane %v96_v22, 2  ;;  %v105_v25 = vadd.f32 %v734_v17, %v104_v23 }
  0x10   :  { %v98_v26 = vadd.f32 %v97_v24, %v96_v22  ;;  %v841_v28 = vsel %vm106_vm1, %v734_v17, %v105_v25 }
  0x12   :  { %v99_v27 = vrot.slane %v98_v26, 1 }
  0x14   :  { %v100_v29 = vadd.f32 %v99_v27, %v98_v26  ;;  %v26_v26 = vlaneseq }
  0x16   :  { %v108_v30 = vmul.f32 %v841_v28, %v100_v29  ;;  %v875_v29 = vshrl.u32 %v26_v26, 7 }
  0x18   :  { %v109_v31 = vsub.f32 %v816_v5, %v108_v30  ;;  %v110_v32 = vsub.f32 %v821_v6, %v108_v30  ;;  %v111_v33 = vsub.f32 %v826_v9, %v108_v30  ;;  %v112_v34 = vsub.f32 %v831_v10, %v108_v30 }
  0x19   :  { %vm226_vm5 = vcmp.lt.s32.totalorder %v875_v29, 1  ;;  %vm258_vm7 = vcmp.lt.s32.totalorder %v875_v29, 7 }
  0x1a   :  { %v113_v35 = vmul.f32 %v109_v31, %v109_v31  ;;  %v114_v36 = vmul.f32 %v110_v32, %v110_v32  ;;  %v115_v37 = vmul.f32 %v111_v33, %v111_v33  ;;  %v116_v38 = vmul.f32 %v112_v34, %v112_v34 }
  0x1b   :  { %v35_v31 = vand.u32 15, %v875_v29  ;;  %v28_v34 = vadd.s32 8, %v875_v29 }
  0x1c   :  { %v117_v39 = vsel %vm87_vm0, %v113_v35, 0.0  ;;  %v118_v40 = vsel %vm87_vm0, %v114_v36, 0.0  ;;  %v120_v41 = vsel %vm87_vm0, %v115_v37, 0.0  ;;  %v122_v43 = vsel %vm87_vm0, %v116_v38, 0.0 }
  0x1d   :  { %v119_v42 = vadd.f32 %v118_v40, %v117_v39  ;;  %vm880_vm6 = vcmp.ne.s32.totalorder %v35_v31, 0  ;;  %v42_v39 = vand.u32 15, %v28_v34  ;;  %v701_v34 = vld [vmem:[%s1110_s3 + $0x40] sm:$0xff] }
  0x1f   :  { %v121_v44 = vadd.f32 %v120_v41, %v119_v42  ;;  %v29_v41 = vadd.s32 16, %v875_v29  ;;  %vm894_vm8 = vcmp.ne.s32.totalorder %v42_v39, 15 }
  0x21   :  { %v123_v45 = vadd.f32 %v122_v43, %v121_v44 }
  0x23   :  { %v124_v46 = vrot.slane %v123_v45, 4 }
  0x25   :  { %v125_v47 = vadd.f32 %v124_v46, %v123_v45 }
  0x27   :  { %v126_v48 = vrot.slane %v125_v47, 2 }
  0x29   :  { %v127_v49 = vadd.f32 %v126_v48, %v125_v47 }
  0x2b   :  { %v128_v50 = vrot.slane %v127_v49, 1 }
  0x2d   :  { %v129_v51 = vadd.f32 %v128_v50, %v127_v49  ;;  %v30_v50 = vadd.s32 24, %v875_v29 }
  0x2f   :  { %v130_v52 = vmul.f32 %v129_v51, %v841_v28 }
  0x31   :  { %v132_v53 = vadd.f32 1e-05, %v130_v52  ;;  %v49_v52 = vand.u32 15, %v29_v41  ;;  %v697_v41 = vld [vmem:[%s1110_s3 + $0x30] sm:$0xff] }
  0x33   :  { %735 = vrsqrt.f32 %v132_v53  ;;  %vm139_vm2 = vweird.f32 %v132_v53  ;;  %vm906_vm9 = vcmp.ne.s32.totalorder %v49_v52, 0 }
  0x39   :  { %v736_v57 = vpop.eup %735 }
  0x3a   :  { %v134_v58 = vmul.f32 %v736_v57, %v132_v53  ;;  %vm140_vm3 = vweird.f32 %v736_v57 }
  0x3b   :  { %vm141_vm4 = vmor %vm139_vm2, %vm140_vm3 }
  0x3c   :  { %v135_v59 = vmul.f32 %v736_v57, %v134_v58 }
  0x3e   :  { %v136_v60 = vmul.f32 0.5, %v135_v59 }
  0x40   :  { %v137_v61 = vsub.f32 1.5, %v136_v60  ;;  %v56_v60 = vand.u32 15, %v30_v50 }
  0x42   :  { %v138_v63 = vmul.f32 %v736_v57, %v137_v61  ;;  %vm914_vm10 = vcmp.ne.s32.totalorder %v56_v60, 15 }
  0x44   :  { %v142_v0 = vsel %vm141_vm4, %v736_v57, %v138_v63  ;;  %v730_v57 = vld [vmem:[%s1111_s4] ss:$0 sm:$0xff] }
  0x45   :  { %v143_v1 = vmul.f32 %v142_v0, %v131_v62 }
  0x47   :  { %v145_v3 = vmul.f32 %v143_v1, %v108_v30  ;;  %v148_v4 = vperm.slane %v143_v1, 0 }
  0x49   :  { %v146_v7 = vsub.f32 %v144_v2, %v145_v3  ;;  %v150_v8 = vmul.f32 %v148_v4, %v816_v5  ;;  %v151_v11 = vmul.f32 %v148_v4, %v821_v6  ;;  %v152_v12 = vmul.f32 %v148_v4, %v826_v9 }
  0x4a   :  { %v153_v13 = vmul.f32 %v148_v4, %v831_v10 }
  0x4b   :  { %v155_v14 = vperm.slane %v146_v7, 0 }
  0x4d   :  { %v157_v15 = vadd.f32 %v155_v14, %v150_v8  ;;  %v158_v16 = vadd.f32 %v155_v14, %v151_v11  ;;  %v159_v17 = vadd.f32 %v155_v14, %v152_v12  ;;  %v160_v18 = vadd.f32 %v155_v14, %v153_v13 }
  0x4f   :  { %v161_v19 = vmax.f32 %v157_v15, 0.0  ;;  %v162_v20 = vmax.f32 %v158_v16, 0.0  ;;  %v163_v21 = vmax.f32 %v159_v17, 0.0  ;;  %v164_v22 = vmax.f32 %v160_v18, 0.0 }
  0x51   :  { %v165_v23 = vpack.c.bf16 %v162_v20, %v161_v19  ;;  %v166_v24 = vpack.c.bf16 %v164_v22, %v163_v21 }
  0x53   :  { %685 = vmatmul.msk.bf16.vlgmr.msra.gmra.mxu0 %vm87_vm0, %v165_v23  ;;  %686 = vmatmul.msk.bf16.vlgmr.msra.gmra.mxu1 %vm87_vm0, %v166_v24 }
  0x54   :  { %693 = vmatmul.msk.bf16.vlgmr.msra.gmra.mxu2 %vm87_vm0, %v165_v23 }
  0x63   :  { %691 = vmatmul.msk.bf16.vlgmr.msrb.gmra.mxu1 %vm87_vm0, %v165_v23 }
  0x64   :  { %694 = vmatmul.msk.bf16.gmra.mxu2 %vm87_vm0, %v166_v24 }
  0x73   :  { %692 = vmatmul.msk.bf16.gmra.mxu1 %vm87_vm0, %v166_v24 }
  0xd0   :  { %v190_v5 = vpop.f32.mrf.mxu1  ;;  %v185_v25 = vpop.f32.mrf.mxu0 }
  0xd1   :  { %v222_v30 = vrot.slane %v185_v25, 7  ;;  %v224_v55 = vrot.slane %v190_v5, 7 }
  0xd7   :  { %v244_v9 = vpop.f32.mrf.mxu2 }
  0xd8   :  { %v192_v6 = vpop.f32.mrf.mxu1  ;;  %v187_v35 = vpop.f32.mrf.mxu0 }
  0xd9   :  { %v225_v32 = vrot.slane %v192_v6, 7  ;;  %v223_v40 = vrot.slane %v187_v35, 7  ;;  %v702_v35 = vld [vmem:[%s1110_s3 + $0x48] sm:$0xff] }
  0xda   :  { %v389_v39 = vpack.c.bf16 %v702_v35, %v701_v34 }
  0xdb   :  { %v230_v37 = vsel %vm226_vm5, %v225_v32, %v222_v30  ;;  %v229_v45 = vsel %vm226_vm5, %v222_v30, %v223_v40  ;;  %v228_v62 = vsel %vm226_vm5, %v223_v40, %v224_v55  ;;  %v227_v11 = vsel %vm226_vm5, %v224_v55, %v225_v32  ;;  %v704_v40 = vld [vmem:[%s1110_s3 + $0x58] sm:$0xff] }
  0xdc   :  { %v231_v43 = vsel %vm880_vm6, %v230_v37, 0.0  ;;  %v233_v3 = vsel %vm906_vm9, %v228_v62, 0.0  ;;  %v703_v37 = vld [vmem:[%s1110_s3 + $0x50] sm:$0xff]  ;;  %432 = vmatpush.bf16.msra.mxu1 %v389_v39 }
  0xdd   :  { %v245_v51 = vadd.f32 %v244_v9, %v231_v43  ;;  %v393_v43 = vpack.c.bf16 %v704_v40, %v703_v37 }
  0xdf   :  { %v246_v27 = vpop.f32.mrf.mxu2  ;;  %401 = vmatpush.bf16.msrb.mxu0 %v393_v43 }
  0xe0   :  { %v212_v10 = vpop.f32.mrf.mxu1  ;;  %v247_v53 = vadd.f32 %v246_v27, %v229_v45 }
  0xe1   :  { %v254_v44 = vrot.slane %v212_v10, 1 }
  0xe7   :  { %v249_v42 = vpop.f32.mrf.mxu2 }
  0xe8   :  { %v214_v33 = vpop.f32.mrf.mxu1  ;;  %v250_v8 = vadd.f32 %v249_v42, %v233_v3  ;;  %v698_v42 = vld [vmem:[%s1110_s3 + $0x38] sm:$0xff] }
  0xe9   :  { %v255_v38 = vrot.slane %v214_v33, 1 }
  0xeb   :  { %v261_v47 = vsel %vm258_vm7, %v254_v44, %v255_v38 }
  0xec   :  { %v267_v56 = vadd.f32 %v261_v47, %v245_v51 }
  0xee   :  { %v275_v0 = vadd.f32 %v730_v57, %v267_v56 }
  0xef   :  { %v251_v1 = vpop.f32.mrf.mxu2 }
  0xf0   :  { %v217_v46 = vpop.f32.mrf.mxu1  ;;  %v252_v13 = vadd.f32 %v251_v1, %v227_v11  ;;  %v926_v16 = vmax.f32 %v275_v0, 0.0 }
  0xf1   :  { %v256_v49 = vrot.slane %v217_v46, 1 }
  0xf2   :  { %v283_v23 = vsel %vm87_vm0, %v926_v16, 0.0 }
  0xf3   :  { %v260_v54 = vsel %vm258_vm7, %v255_v38, %v256_v49 }
  0xf4   :  { %v264_v58 = vsel %vm894_vm8, %v260_v54, 0.0 }
  0xf5   :  { %v268_v59 = vadd.f32 %v264_v58, %v247_v53 }
  0xf7   :  { %v276_v63 = vadd.f32 %v730_v57, %v268_v59 }
  0xf8   :  { %v219_v2 = vpop.f32.mrf.mxu1 }
  0xf9   :  { %v257_v7 = vrot.slane %v219_v2, 1  ;;  %v920_v12 = vmax.f32 %v276_v63, 0.0 }
  0xfb   :  { %v259_v14 = vsel %vm258_vm7, %v256_v49, %v257_v7  ;;  %v262_v15 = vsel %vm258_vm7, %v257_v7, %v254_v44  ;;  %v284_v20 = vsel %vm87_vm0, %v920_v12, 0.0  ;;  %v360_v44 = vpack.c.bf16 %v698_v42, %v697_v41 }
  0xfc   :  { %v266_v17 = vsel %vm914_vm10, %v262_v15, 0.0  ;;  %v269_v18 = vadd.f32 %v259_v14, %v250_v8  ;;  %v285_v5 = vadd.f32 %v284_v20, %v283_v23  ;;  %v696_v23 = vld [vmem:[%s1109_s2 + $0x1] sm:$0x1] }
  0xfd   :  { %v270_v19 = vadd.f32 %v266_v17, %v252_v13  ;;  %374 = vmatpush.bf16.msra.mxu3 %v360_v44 }
  0xfe   :  { %v277_v21 = vadd.f32 %v730_v57, %v269_v18 }
  0xff   :  { %v278_v22 = vadd.f32 %v730_v57, %v270_v19  ;;  %v695_v19 = vld [vmem:[%s1108_s1 + $0x1] sm:$0x1] }
 0x100   :  { %v934_v24 = vmax.f32 %v277_v21, 0.0 }
 0x101   :  { %v936_v6 = vmax.f32 %v278_v22, 0.0 }
 0x102   :  { %v286_v9 = vsel %vm87_vm0, %v934_v24, 0.0 }
 0x103   :  { %v287_v10 = vadd.f32 %v286_v9, %v285_v5  ;;  %v288_v25 = vsel %vm87_vm0, %v936_v6, 0.0 }
 0x105   :  { %v289_v26 = vadd.f32 %v288_v25, %v287_v10 }
 0x107   :  { %v290_v27 = vrot.slane %v289_v26, 4 }
 0x109   :  { %v291_v30 = vadd.f32 %v290_v27, %v289_v26 }
 0x10b   :  { %v292_v31 = vrot.slane %v291_v30, 2 }
 0x10d   :  { %v293_v32 = vadd.f32 %v292_v31, %v291_v30 }
 0x10f   :  { %v294_v33 = vrot.slane %v293_v32, 1 }
 0x111   :  { %v295_v38 = vadd.f32 %v294_v33, %v293_v32 }
 0x113   :  { %v296_v45 = vmul.f32 %v295_v38, %v841_v28 }
 0x115   :  { %v297_v46 = vsub.f32 %v926_v16, %v296_v45  ;;  %v298_v47 = vsub.f32 %v920_v12, %v296_v45  ;;  %v299_v49 = vsub.f32 %v934_v24, %v296_v45  ;;  %v300_v50 = vsub.f32 %v936_v6, %v296_v45 }
 0x117   :  { %v301_v51 = vmul.f32 %v297_v46, %v297_v46  ;;  %v302_v52 = vmul.f32 %v298_v47, %v298_v47  ;;  %v303_v53 = vmul.f32 %v299_v49, %v299_v49  ;;  %v304_v54 = vmul.f32 %v300_v50, %v300_v50 }
 0x119   :  { %v305_v55 = vsel %vm87_vm0, %v301_v51, 0.0  ;;  %v306_v56 = vsel %vm87_vm0, %v302_v52, 0.0  ;;  %v308_v58 = vsel %vm87_vm0, %v303_v53, 0.0  ;;  %v310_v60 = vsel %vm87_vm0, %v304_v54, 0.0 }
 0x11a   :  { %v307_v57 = vadd.f32 %v306_v56, %v305_v55 }
 0x11c   :  { %v309_v59 = vadd.f32 %v308_v58, %v307_v57 }
 0x11e   :  { %v311_v62 = vadd.f32 %v310_v60, %v309_v59 }
 0x120   :  { %v312_v63 = vrot.slane %v311_v62, 4 }
 0x122   :  { %v313_v0 = vadd.f32 %v312_v63, %v311_v62 }
 0x124   :  { %v314_v1 = vrot.slane %v313_v0, 2 }
 0x126   :  { %v315_v2 = vadd.f32 %v314_v1, %v313_v0 }
 0x128   :  { %v316_v3 = vrot.slane %v315_v2, 1 }
 0x12a   :  { %v317_v7 = vadd.f32 %v316_v3, %v315_v2 }
 0x12c   :  { %v318_v8 = vmul.f32 %v317_v7, %v841_v28  ;;  %v731_v7 = vld [vmem:[%s1111_s4 + $0x1] ss:$0 sm:$0xff] }
 0x12e   :  { %v321_v11 = vadd.f32 1e-05, %v318_v8 }
 0x130   :  { %737 = vrsqrt.f32 %v321_v11  ;;  %vm328_vm12 = vweird.f32 %v321_v11 }
 0x136   :  { %v738_v13 = vpop.eup %737 }
 0x137   :  { %v323_v14 = vmul.f32 %v738_v13, %v321_v11  ;;  %vm329_vm11 = vweird.f32 %v738_v13 }
 0x138   :  { %vm330_vm13 = vmor %vm328_vm12, %vm329_vm11 }
 0x139   :  { %v324_v15 = vmul.f32 %v738_v13, %v323_v14 }
 0x13b   :  { %v325_v17 = vmul.f32 0.5, %v324_v15 }
 0x13d   :  { %v326_v18 = vsub.f32 1.5, %v325_v17 }
 0x13f   :  { %v327_v20 = vmul.f32 %v738_v13, %v326_v18 }
 0x141   :  { %v331_v21 = vsel %vm330_vm13, %v738_v13, %v327_v20 }
 0x142   :  { %v332_v22 = vmul.f32 %v695_v19, %v331_v21 }
 0x144   :  { %v335_v5 = vmul.f32 %v332_v22, %v296_v45  ;;  %v338_v9 = vperm.slane %v332_v22, 0 }
 0x146   :  { %v336_v10 = vsub.f32 %v696_v23, %v335_v5  ;;  %v340_v25 = vmul.f32 %v338_v9, %v926_v16  ;;  %v341_v26 = vmul.f32 %v338_v9, %v920_v12  ;;  %v342_v35 = vmul.f32 %v338_v9, %v934_v24 }
 0x147   :  { %v343_v37 = vmul.f32 %v338_v9, %v936_v6 }
 0x148   :  { %v345_v27 = vperm.slane %v336_v10, 0 }
 0x14a   :  { %v347_v30 = vadd.f32 %v345_v27, %v340_v25  ;;  %v348_v31 = vadd.f32 %v345_v27, %v341_v26  ;;  %v349_v38 = vadd.f32 %v345_v27, %v342_v35  ;;  %v350_v16 = vadd.f32 %v345_v27, %v343_v37 }
 0x14c   :  { %v351_v32 = vmax.f32 %v347_v30, 0.0  ;;  %v352_v33 = vmax.f32 %v348_v31, 0.0  ;;  %v353_v39 = vmax.f32 %v349_v38, 0.0  ;;  %v354_v12 = vmax.f32 %v350_v16, 0.0 }
 0x14e   :  { %v355_v34 = vpack.c.bf16 %v352_v33, %v351_v32  ;;  %v356_v40 = vpack.c.bf16 %v354_v12, %v353_v39 }
 0x150   :  { %699 = vmatmul.msk.bf16.vlgmr.msra.gmra.mxu3 %vm87_vm0, %v355_v34  ;;  %705 = vmatmul.msk.bf16.vlgmr.msrb.gmra.mxu0 %vm87_vm0, %v355_v34 }
 0x151   :  { %707 = vmatmul.msk.bf16.vlgmr.msra.gmra.mxu1 %vm87_vm0, %v355_v34 }
 0x160   :  { %700 = vmatmul.msk.bf16.gmra.mxu3 %vm87_vm0, %v356_v40  ;;  %706 = vmatmul.msk.bf16.gmra.mxu0 %vm87_vm0, %v356_v40 }
 0x161   :  { %708 = vmatmul.msk.bf16.gmra.mxu1 %vm87_vm0, %v356_v40 }
 0x1cd   :  { %v403_v41 = vpop.f32.mrf.mxu0 }
 0x1ce   :  { %v434_v42 = vpop.f32.mrf.mxu1  ;;  %v444_v0 = vrot.slane %v403_v41, 1 }
 0x1d3   :  { %v376_v43 = vpop.f32.mrf.mxu3 }
 0x1d4   :  { %v413_v49 = vrot.slane %v376_v43, 7 }
 0x1d5   :  { %v405_v44 = vpop.f32.mrf.mxu0 }
 0x1d6   :  { %v436_v45 = vpop.f32.mrf.mxu1  ;;  %v445_v51 = vrot.slane %v405_v44, 1 }
 0x1d8   :  { %v450_v23 = vsel %vm258_vm7, %v444_v0, %v445_v51 }
 0x1db   :  { %v378_v46 = vpop.f32.mrf.mxu3 }
 0x1dc   :  { %v414_v47 = vrot.slane %v378_v46, 7 }
 0x1dd   :  { %v408_v24 = vpop.f32.mrf.mxu0 }
 0x1de   :  { %v446_v6 = vrot.slane %v408_v24, 1  ;;  %v439_v52 = vpop.f32.mrf.mxu1  ;;  %v419_v54 = vsel %vm226_vm5, %v413_v49, %v414_v47 }
 0x1df   :  { %v437_v60 = vadd.f32 %v436_v45, %v419_v54  ;;  %v718_v54 = vld [vmem:[%s1110_s3 + $0x80] sm:$0xff] }
 0x1e0   :  { %v449_v56 = vsel %vm258_vm7, %v445_v51, %v446_v6 }
 0x1e1   :  { %v453_v62 = vsel %vm894_vm8, %v449_v56, 0.0  ;;  %v719_v56 = vld [vmem:[%s1110_s3 + $0x88] sm:$0xff] }
 0x1e2   :  { %v457_v3 = vadd.f32 %v453_v62, %v437_v60 }
 0x1e3   :  { %v381_v50 = vpop.f32.mrf.mxu3 }
 0x1e4   :  { %v415_v53 = vrot.slane %v381_v50, 7  ;;  %v466_v20 = vadd.f32 %v731_v7, %v457_v3 }
 0x1e5   :  { %v410_v55 = vpop.f32.mrf.mxu0 }
 0x1e6   :  { %v418_v57 = vsel %vm226_vm5, %v414_v47, %v415_v53  ;;  %v447_v59 = vrot.slane %v410_v55, 1  ;;  %v441_v14 = vpop.f32.mrf.mxu1  ;;  %v1013_v25 = vmax.f32 %v466_v20, 0.0 }
 0x1e7   :  { %v423_v58 = vsel %vm906_vm9, %v418_v57, 0.0  ;;  %v716_v57 = vld [vmem:[%s1110_s3 + $0x70] sm:$0xff] }
 0x1e8   :  { %v440_v63 = vadd.f32 %v439_v52, %v423_v58  ;;  %v448_v1 = vsel %vm258_vm7, %v446_v6, %v447_v59  ;;  %v451_v11 = vsel %vm258_vm7, %v447_v59, %v444_v0  ;;  %v474_v32 = vsel %vm87_vm0, %v1013_v25, 0.0  ;;  %v712_v52 = vld [vmem:[%s1110_s3 + $0x60] sm:$0xff]  ;;  %v717_v58 = vld [vmem:[%s1110_s3 + $0x78] sm:$0xff] }
 0x1e9   :  { %v455_v21 = vsel %vm914_vm10, %v451_v11, 0.0  ;;  %v583_v0 = vpack.c.bf16 %v719_v56, %v718_v54 }
 0x1ea   :  { %v458_v13 = vadd.f32 %v448_v1, %v440_v63  ;;  %v579_v1 = vpack.c.bf16 %v717_v58, %v716_v57 }
 0x1eb   :  { %v383_v2 = vpop.f32.mrf.mxu3  ;;  %591 = vmatpush.bf16.msrb.mxu3 %v583_v0  ;;  %v732_v0 = vld [vmem:[%s1111_s4 + $0x2] ss:$0 sm:$0xff]  ;;  %s768_s4 = smov [#allocation2]  }
 0x1ec   :  { %v416_v8 = vrot.slane %v383_v2, 7  ;;  %v467_v9 = vadd.f32 %v731_v7, %v458_v13  ;;  %622 = vmatpush.bf16.msra.mxu0 %v579_v1  ;;  %s671_s25 = sshll.u32 %s768_s4, 4  ;;  %s672_s25 = int_to_ptr.vmem [resolvable:$true] %s671_s25 }
 0x1ee   :  { %v417_v15 = vsel %vm226_vm5, %v415_v53, %v416_v8  ;;  %v420_v17 = vsel %vm226_vm5, %v416_v8, %v413_v49  ;;  %v1015_v30 = vmax.f32 %v467_v9, 0.0  ;;  %v713_v53 = vld [vmem:[%s1110_s3 + $0x68] sm:$0xff] }
 0x1ef   :  { %v421_v18 = vsel %vm880_vm6, %v420_v17, 0.0  ;;  %v442_v19 = vadd.f32 %v441_v14, %v417_v15  ;;  %v550_v55 = vpack.c.bf16 %v713_v53, %v712_v52 }
 0x1f0   :  { %v435_v22 = vadd.f32 %v434_v42, %v421_v18  ;;  %v476_v37 = vsel %vm87_vm0, %v1015_v30, 0.0 }
 0x1f1   :  { %v459_v5 = vadd.f32 %v455_v21, %v442_v19  ;;  %564 = vmatpush.bf16.msrb.mxu2 %v550_v55 }
 0x1f2   :  { %v456_v10 = vadd.f32 %v450_v23, %v435_v22 }
 0x1f3   :  { %v468_v27 = vadd.f32 %v731_v7, %v459_v5 }
 0x1f4   :  { %v465_v26 = vadd.f32 %v731_v7, %v456_v10  ;;  %v710_v10 = vld [vmem:[%s1108_s1 + $0x2] sm:$0x1] }
 0x1f5   :  { %v1021_v33 = vmax.f32 %v468_v27, 0.0 }
 0x1f6   :  { %v1017_v31 = vmax.f32 %v465_v26, 0.0 }
 0x1f7   :  { %v478_v16 = vsel %vm87_vm0, %v1021_v33, 0.0 }
 0x1f8   :  { %v473_v34 = vsel %vm87_vm0, %v1017_v31, 0.0 }
 0x1f9   :  { %v475_v35 = vadd.f32 %v474_v32, %v473_v34 }
 0x1fb   :  { %v477_v38 = vadd.f32 %v476_v37, %v475_v35 }
 0x1fd   :  { %v479_v39 = vadd.f32 %v478_v16, %v477_v38 }
 0x1ff   :  { %v480_v12 = vrot.slane %v479_v39, 4 }
 0x201   :  { %v481_v40 = vadd.f32 %v480_v12, %v479_v39 }
 0x203   :  { %v482_v41 = vrot.slane %v481_v40, 2 }
 0x205   :  { %v483_v42 = vadd.f32 %v482_v41, %v481_v40 }
 0x207   :  { %v484_v43 = vrot.slane %v483_v42, 1 }
 0x209   :  { %v485_v44 = vadd.f32 %v484_v43, %v483_v42 }
 0x20b   :  { %v486_v45 = vmul.f32 %v485_v44, %v841_v28 }
 0x20d   :  { %v487_v46 = vsub.f32 %v1017_v31, %v486_v45  ;;  %v488_v24 = vsub.f32 %v1013_v25, %v486_v45  ;;  %v489_v47 = vsub.f32 %v1015_v30, %v486_v45  ;;  %v490_v6 = vsub.f32 %v1021_v33, %v486_v45 }
 0x20f   :  { %v491_v49 = vmul.f32 %v487_v46, %v487_v46  ;;  %v492_v50 = vmul.f32 %v488_v24, %v488_v24  ;;  %v493_v51 = vmul.f32 %v489_v47, %v489_v47  ;;  %v494_v59 = vmul.f32 %v490_v6, %v490_v6 }
 0x211   :  { %v495_v60 = vsel %vm87_vm0, %v491_v49, 0.0  ;;  %v496_v62 = vsel %vm87_vm0, %v492_v50, 0.0  ;;  %v498_v2 = vsel %vm87_vm0, %v493_v51, 0.0  ;;  %v500_v7 = vsel %vm87_vm0, %v494_v59, 0.0 }
 0x212   :  { %v497_v63 = vadd.f32 %v496_v62, %v495_v60 }
 0x214   :  { %v499_v3 = vadd.f32 %v498_v2, %v497_v63 }
 0x216   :  { %v501_v8 = vadd.f32 %v500_v7, %v499_v3 }
 0x218   :  { %v502_v11 = vrot.slane %v501_v8, 4 }
 0x21a   :  { %v503_v13 = vadd.f32 %v502_v11, %v501_v8 }
 0x21c   :  { %v504_v14 = vrot.slane %v503_v13, 2 }
 0x21e   :  { %v505_v15 = vadd.f32 %v504_v14, %v503_v13 }
 0x220   :  { %v506_v17 = vrot.slane %v505_v15, 1 }
 0x222   :  { %v507_v18 = vadd.f32 %v506_v17, %v505_v15 }
 0x224   :  { %v508_v19 = vmul.f32 %v507_v18, %v841_v28  ;;  %v711_v28 = vld [vmem:[%s1109_s2 + $0x2] sm:$0x1] }
 0x226   :  { %v511_v20 = vadd.f32 1e-05, %v508_v19 }
 0x228   :  { %739 = vrsqrt.f32 %v511_v20  ;;  %vm518_vm15 = vweird.f32 %v511_v20 }
 0x22e   :  { %v740_v21 = vpop.eup %739 }
 0x22f   :  { %v513_v22 = vmul.f32 %v740_v21, %v511_v20  ;;  %vm519_vm14 = vweird.f32 %v740_v21 }
 0x230   :  { %vm520_vm1 = vmor %vm518_vm15, %vm519_vm14 }
 0x231   :  { %v514_v23 = vmul.f32 %v740_v21, %v513_v22 }
 0x233   :  { %v515_v5 = vmul.f32 0.5, %v514_v23 }
 0x235   :  { %v516_v9 = vsub.f32 1.5, %v515_v5 }
 0x237   :  { %v517_v26 = vmul.f32 %v740_v21, %v516_v9 }
 0x239   :  { %v521_v27 = vsel %vm520_vm1, %v740_v21, %v517_v26 }
 0x23a   :  { %v522_v32 = vmul.f32 %v710_v10, %v521_v27 }
 0x23c   :  { %v525_v34 = vmul.f32 %v522_v32, %v486_v45  ;;  %v528_v35 = vperm.slane %v522_v32, 0 }
 0x23e   :  { %v526_v37 = vsub.f32 %v711_v28, %v525_v34  ;;  %v530_v38 = vmul.f32 %v528_v35, %v1017_v31  ;;  %v531_v16 = vmul.f32 %v528_v35, %v1013_v25  ;;  %v532_v44 = vmul.f32 %v528_v35, %v1015_v30 }
 0x23f   :  { %v533_v45 = vmul.f32 %v528_v35, %v1021_v33 }
 0x240   :  { %v535_v39 = vperm.slane %v526_v37, 0 }
 0x242   :  { %v537_v12 = vadd.f32 %v535_v39, %v530_v38  ;;  %v538_v40 = vadd.f32 %v535_v39, %v531_v16  ;;  %v539_v46 = vadd.f32 %v535_v39, %v532_v44  ;;  %v540_v31 = vadd.f32 %v535_v39, %v533_v45 }
 0x244   :  { %v541_v41 = vmax.f32 %v537_v12, 0.0  ;;  %v542_v42 = vmax.f32 %v538_v40, 0.0  ;;  %v543_v24 = vmax.f32 %v539_v46, 0.0  ;;  %v544_v25 = vmax.f32 %v540_v31, 0.0 }
 0x246   :  { %v545_v43 = vpack.c.bf16 %v542_v42, %v541_v41  ;;  %v546_v47 = vpack.c.bf16 %v544_v25, %v543_v24 }
 0x248   :  { %714 = vmatmul.msk.bf16.vlgmr.msrb.gmra.mxu2 %vm87_vm0, %v545_v43  ;;  %720 = vmatmul.msk.bf16.vlgmr.msrb.gmra.mxu3 %vm87_vm0, %v545_v43 }
 0x249   :  { %722 = vmatmul.msk.bf16.vlgmr.msra.gmra.mxu0 %vm87_vm0, %v545_v43 }
 0x258   :  { %715 = vmatmul.msk.bf16.gmra.mxu2 %vm87_vm0, %v546_v47  ;;  %721 = vmatmul.msk.bf16.gmra.mxu3 %vm87_vm0, %v546_v47 }
 0x259   :  { %723 = vmatmul.msk.bf16.gmra.mxu0 %vm87_vm0, %v546_v47 }
 0x2c6   :  { %v624_v6 = vpop.f32.mrf.mxu0 }
 0x2cb   :  { %v566_v49 = vpop.f32.mrf.mxu2  ;;  %v593_v50 = vpop.f32.mrf.mxu3 }
 0x2cc   :  { %v603_v54 = vrot.slane %v566_v49, 7  ;;  %v634_v14 = vrot.slane %v593_v50, 1 }
 0x2ce   :  { %v626_v51 = vpop.f32.mrf.mxu0 }
 0x2d3   :  { %v568_v52 = vpop.f32.mrf.mxu2  ;;  %v595_v53 = vpop.f32.mrf.mxu3 }
 0x2d4   :  { %v604_v30 = vrot.slane %v568_v52, 7  ;;  %v635_v57 = vrot.slane %v595_v53, 1 }
 0x2d6   :  { %v609_v33 = vsel %vm226_vm5, %v603_v54, %v604_v30  ;;  %v629_v58 = vpop.f32.mrf.mxu0  ;;  %v640_v27 = vsel %vm258_vm7, %v634_v14, %v635_v57 }
 0x2d7   :  { %v627_v62 = vadd.f32 %v626_v51, %v609_v33 }
 0x2db   :  { %v571_v55 = vpop.f32.mrf.mxu2  ;;  %v598_v56 = vpop.f32.mrf.mxu3 }
 0x2dc   :  { %v605_v59 = vrot.slane %v571_v55, 7  ;;  %v636_v60 = vrot.slane %v598_v56, 1 }
 0x2de   :  { %v639_v63 = vsel %vm258_vm7, %v635_v57, %v636_v60  ;;  %v608_v1 = vsel %vm226_vm5, %v604_v30, %v605_v59  ;;  %v631_v20 = vpop.f32.mrf.mxu0 }
 0x2df   :  { %v643_v2 = vsel %vm894_vm8, %v639_v63, 0.0  ;;  %v613_v7 = vsel %vm906_vm9, %v608_v1, 0.0 }
 0x2e0   :  { %v647_v3 = vadd.f32 %v643_v2, %v627_v62  ;;  %v630_v19 = vadd.f32 %v629_v58, %v613_v7 }
 0x2e2   :  { %v656_v8 = vadd.f32 %v732_v0, %v647_v3 }
 0x2e3   :  { %v573_v11 = vpop.f32.mrf.mxu2  ;;  %v600_v13 = vpop.f32.mrf.mxu3 }
 0x2e4   :  { %v660_v15 = vmax.f32 %v656_v8, 0.0  ;;  %v606_v17 = vrot.slane %v573_v11, 7  ;;  %v637_v18 = vrot.slane %v600_v13, 1 }
 0x2e6   :  { %664 = vst.msk [vmem:[#allocation2 + $0x8] sm:$0xff] %vm87_vm0, %v660_v15  ;;  %v607_v21 = vsel %vm226_vm5, %v605_v59, %v606_v17  ;;  %v610_v48 = vsel %vm226_vm5, %v606_v17, %v603_v54  ;;  %v638_v61 = vsel %vm258_vm7, %v636_v60, %v637_v18  ;;  %v641_v22 = vsel %vm258_vm7, %v637_v18, %v634_v14 }
 0x2e7   :  { %v611_v23 = vsel %vm880_vm6, %v610_v48, 0.0  ;;  %v632_v5 = vadd.f32 %v631_v20, %v607_v21  ;;  %v645_v9 = vsel %vm914_vm10, %v641_v22, 0.0  ;;  %v648_v10 = vadd.f32 %v638_v61, %v630_v19 }
 0x2e8   :  { %v625_v26 = vadd.f32 %v624_v6, %v611_v23 }
 0x2e9   :  { %v649_v32 = vadd.f32 %v645_v9, %v632_v5  ;;  %v657_v28 = vadd.f32 %v732_v0, %v648_v10 }
 0x2ea   :  { %v646_v34 = vadd.f32 %v640_v27, %v625_v26 }
 0x2eb   :  { %v658_v36 = vadd.f32 %v732_v0, %v649_v32  ;;  %v661_v35 = vmax.f32 %v657_v28, 0.0 }
 0x2ec   :  { %v655_v37 = vadd.f32 %v732_v0, %v646_v34 }
 0x2ed   :  { %v662_v38 = vmax.f32 %v658_v36, 0.0  ;;  %665 = vst.msk [vmem:[#allocation2 + $0x10] sm:$0xff] %vm87_vm0, %v661_v35 }
 0x2ee   :  { %v659_v4 = vmax.f32 %v655_v37, 0.0 }
 0x2ef   :  { %666 = vst.msk [vmem:[#allocation2 + $0x18] sm:$0xff] %vm87_vm0, %v662_v38 }
 0x2f0   :  { %663 = vst.msk [vmem:[#allocation2] sm:$0xff] %vm87_vm0, %v659_v4 }
 0x2f1   :  { %679 = dma.vmem_to_hbm [thread:$0]  %s672_s25, 512, %s674_s28, [#allocation3], %s769_s29, %s769_s29, %s770_s30  }
 0x2f2   :  { %765 = dma.done.wait [#allocation3], 512  }
 0x2f3   :  { %766 = vsyncadd [#allocation3], 4294966784 }
 0x2f4   :  { %684 = vsyncpa [#allocation3], 1 }

</bundles_post_ra>
